<compile_context>
chip_gen: v7x
topology: tpu7x:2x2x1
jax: 0.10.0
libtpu: 0.0.40
codegen_flags: <defaults>
</compile_context>

<pallas_src>
import jax
import jax.numpy as jnp
from jax.experimental import pallas as pl
from jax.experimental.pallas import tpu as pltpu

FEAT_IN = 8       # input features of linear1
FEAT_PAD = 8      # all layer widths (8,6,4,2,1) zero-padded to 8 sublanes
NUM_LAYERS = 4
LANE = 128


def mlp_kernel(xT_ref, wt_ref, b_ref, oT_ref):
    """Fused forward pass for one batch tile, batch on the lane axis.

    xT_ref : (8, TILE)   f32 input activations, features x batch (pre-transposed)
    wt_ref : (4, 8, 8)   f32 packed transposed weights: wt[l, :fo, :fi] = W_l^T
    b_ref  : (4, 8, 1)   f32 packed biases:             b[l, :fo, 0]   = b_l
    oT_ref : (1, TILE)   f32 lane-dense output row (real scalar output per batch elem)
    """
    h = xT_ref[...]                                           # (8, tile)
    for l in range(NUM_LAYERS):
        # Zero-padded W^T columns (dead input features) cancel the
        # sigmoid(0)=0.5 garbage sitting in padded activation rows.
        z = jnp.dot(wt_ref[l], h, preferred_element_type=jnp.float32)  # (8, tile)
        h = jax.nn.sigmoid(z + b_ref[l])                      # (8,1) bias broadcasts over lanes
    oT_ref[...] = h[0:1, :].astype(oT_ref.dtype)              # row 0 holds the real output


def _round_up(a, b):
    return (a + b - 1) // b * b


def pack_params(params):
    """Pack (W, b) pairs (W: (fan_in, fan_out), b: (1, fan_out)) into small slabs."""
    wt = jnp.zeros((NUM_LAYERS, FEAT_PAD, FEAT_PAD), jnp.float32)
    bias = jnp.zeros((NUM_LAYERS, FEAT_PAD, 1), jnp.float32)
    for l, (w, b) in enumerate(params):
        fi, fo = w.shape
        wt = wt.at[l, :fo, :fi].set(w.T)          # store W^T, zero-padded to (8, 8)
        bias = bias.at[l, :fo, 0].set(b.reshape(-1))
    return wt, bias


def mlp_forward(x, wt, bias, tile_n=8192):
    """y = sigmoid(...sigmoid(x @ W1 + b1)... @ W4 + b4), returns (N, 1)."""
    n, d = x.shape
    assert d == FEAT_IN
    rup = _round_up(n, LANE)
    tile = min(tile_n, rup)
    if tile == rup and tile >= 2 * LANE:
        # A single grid step would leave v7x's second TensorCore idle: split in two.
        tile = _round_up(tile // 2, LANE)
    n_pad = _round_up(n, tile)
    # Pre-transpose so the batch lands on the lane axis inside the kernel.
    xT = jnp.pad(x, ((0, n_pad - n), (0, 0))).T               # (8, n_pad)

    out = pl.pallas_call(
        mlp_kernel,
        out_shape=jax.ShapeDtypeStruct((1, n_pad), jnp.float32),
        grid=(n_pad // tile,),
        in_specs=[
            pl.BlockSpec((FEAT_IN, tile), lambda i: (0, i)),
            # Constant index_maps -> tiny weight/bias slabs stay resident in VMEM.
            pl.BlockSpec((NUM_LAYERS, FEAT_PAD, FEAT_PAD), lambda i: (0, 0, 0)),
            pl.BlockSpec((NUM_LAYERS, FEAT_PAD, 1), lambda i: (0, 0, 0)),
        ],
        out_specs=pl.BlockSpec((1, tile), lambda i: (0, i)),
        compiler_params=pltpu.CompilerParams(
            dimension_semantics=("parallel",)),
    )(xT, wt, bias)
    return out[0, :n].reshape(n, 1)


def init_linear(key, fan_in, fan_out):
    # Mimic torch.nn.Linear default init: U(-1/sqrt(fan_in), 1/sqrt(fan_in)).
    kw, kb = jax.random.split(key)
    bound = 1.0 / jnp.sqrt(fan_in)
    w = jax.random.uniform(kw, (fan_in, fan_out), jnp.float32, -bound, bound)
    b = jax.random.uniform(kb, (1, fan_out), jnp.float32, -bound, bound)
    return w, b


def reference_forward(x, params):
    h = x
    for w, b in params:
        h = jax.nn.sigmoid(h @ w + b)
    return h


if __name__ == "__main__":
    key = jax.random.PRNGKey(0)
    kx, k1, k2, k3, k4 = jax.random.split(key, 5)

    params = (
        init_linear(k1, 8, 6),
        init_linear(k2, 6, 4),
        init_linear(k3, 4, 2),
        init_linear(k4, 2, 1),
    )
    wt, bias = pack_params(params)

    # Small case matching the module spec (batch=8, in_features=8).
    x = jax.random.normal(kx, (8, 8), jnp.float32)
    out = mlp_forward(x, wt, bias)
    jax.block_until_ready(out)
    ref = reference_forward(x, params)
    assert out.shape == (8, 1)
    assert jnp.allclose(out, ref, atol=1e-5, rtol=1e-5)

    # Larger, non-tile-multiple batch to exercise the multi-step grid + padding path.
    xb = jax.random.normal(kx, (1031, 8), jnp.float32)
    outb = mlp_forward(xb, wt, bias)
    jax.block_until_ready(outb)
    refb = reference_forward(xb, params)
    assert outb.shape == (1031, 1)
    assert jnp.allclose(outb, refb, atol=1e-5, rtol=1e-5)

    print("KERNEL_OK")
</pallas_src>

<mosaic_0001>
module attributes {stable_mosaic.version = 11 : i64} {
  func.func @mlp_kernel(%arg0: i32, %arg1: memref<8x128xf32, #tpu.memory_space<vmem>>, %arg2: memref<4x8x8xf32, #tpu.memory_space<vmem>>, %arg3: memref<4x8x1xf32, #tpu.memory_space<vmem>>, %arg4: memref<1x128xf32, #tpu.memory_space<vmem>>) attributes {dimension_semantics = [#tpu.dimension_semantics<parallel>], iteration_bounds = array<i64: 1>, scalar_prefetch = 0 : i64, scratch_operands = 0 : i64, tpu.core_type = #tpu.core_type<tc>, window_params = [{transform_indices = @transform_0, window_bounds = array<i64: 8, 128>}, {pipeline_mode = #tpu.pipeline_mode<synchronous>, transform_indices = @transform_1, window_bounds = array<i64: 4, 8, 8>}, {pipeline_mode = #tpu.pipeline_mode<synchronous>, transform_indices = @transform_2, window_bounds = array<i64: 4, 8, 1>}, {transform_indices = @transform_3, window_bounds = array<i64: 1, 128>}]} {
    %c0 = arith.constant 0 : index
    %c0_0 = arith.constant 0 : index
    %0 = vector.load %arg1[%c0, %c0_0] : memref<8x128xf32, #tpu.memory_space<vmem>>, vector<8x128xf32>
    %c0_1 = arith.constant 0 : index
    %c0_2 = arith.constant 0 : index
    %c0_3 = arith.constant 0 : index
    %1 = vector.load %arg2[%c0_1, %c0_2, %c0_3] : memref<4x8x8xf32, #tpu.memory_space<vmem>>, vector<1x8x8xf32>
    %2 = vector.shape_cast %1 : vector<1x8x8xf32> to vector<8x8xf32>
    %cst = arith.constant dense<0.000000e+00> : vector<8x128xf32>
    %3 = tpu.matmul %2, %0, %cst {dimension_numbers = #tpu.dot_dimension_numbers<[1], [0], [0], [1], [0, 0, 1, 1], [], []>} : vector<8x8xf32>, vector<8x128xf32>, vector<8x128xf32> -> vector<8x128xf32>
    %c0_4 = arith.constant 0 : index
    %c0_5 = arith.constant 0 : index
    %c0_6 = arith.constant 0 : index
    %4 = vector.load %arg3[%c0_4, %c0_5, %c0_6] : memref<4x8x1xf32, #tpu.memory_space<vmem>>, vector<1x8x1xf32>
    %5 = vector.shape_cast %4 : vector<1x8x1xf32> to vector<8x1xf32>
    %6 = vector.broadcast %5 : vector<8x1xf32> to vector<8x128xf32>
    %7 = arith.addf %3, %6 : vector<8x128xf32>
    %8 = arith.negf %7 : vector<8x128xf32>
    %9 = math.exp %8 : vector<8x128xf32>
    %cst_7 = arith.constant 1.000000e+00 : f32
    %10 = vector.broadcast %cst_7 : f32 to vector<8x128xf32>
    %11 = arith.addf %10, %9 : vector<8x128xf32>
    %12 = arith.divf %10, %11 : vector<8x128xf32>
    %c1 = arith.constant 1 : index
    %c0_8 = arith.constant 0 : index
    %c0_9 = arith.constant 0 : index
    %13 = vector.load %arg2[%c1, %c0_8, %c0_9] : memref<4x8x8xf32, #tpu.memory_space<vmem>>, vector<1x8x8xf32>
    %14 = vector.shape_cast %13 : vector<1x8x8xf32> to vector<8x8xf32>
    %cst_10 = arith.constant dense<0.000000e+00> : vector<8x128xf32>
    %15 = tpu.matmul %14, %12, %cst_10 {dimension_numbers = #tpu.dot_dimension_numbers<[1], [0], [0], [1], [0, 0, 1, 1], [], []>} : vector<8x8xf32>, vector<8x128xf32>, vector<8x128xf32> -> vector<8x128xf32>
    %c1_11 = arith.constant 1 : index
    %c0_12 = arith.constant 0 : index
    %c0_13 = arith.constant 0 : index
    %16 = vector.load %arg3[%c1_11, %c0_12, %c0_13] : memref<4x8x1xf32, #tpu.memory_space<vmem>>, vector<1x8x1xf32>
    %17 = vector.shape_cast %16 : vector<1x8x1xf32> to vector<8x1xf32>
    %18 = vector.broadcast %17 : vector<8x1xf32> to vector<8x128xf32>
    %19 = arith.addf %15, %18 : vector<8x128xf32>
    %20 = arith.negf %19 : vector<8x128xf32>
    %21 = math.exp %20 : vector<8x128xf32>
    %cst_14 = arith.constant 1.000000e+00 : f32
    %22 = vector.broadcast %cst_14 : f32 to vector<8x128xf32>
    %23 = arith.addf %22, %21 : vector<8x128xf32>
    %24 = arith.divf %22, %23 : vector<8x128xf32>
    %c2 = arith.constant 2 : index
    %c0_15 = arith.constant 0 : index
    %c0_16 = arith.constant 0 : index
    %25 = vector.load %arg2[%c2, %c0_15, %c0_16] : memref<4x8x8xf32, #tpu.memory_space<vmem>>, vector<1x8x8xf32>
    %26 = vector.shape_cast %25 : vector<1x8x8xf32> to vector<8x8xf32>
    %cst_17 = arith.constant dense<0.000000e+00> : vector<8x128xf32>
    %27 = tpu.matmul %26, %24, %cst_17 {dimension_numbers = #tpu.dot_dimension_numbers<[1], [0], [0], [1], [0, 0, 1, 1], [], []>} : vector<8x8xf32>, vector<8x128xf32>, vector<8x128xf32> -> vector<8x128xf32>
    %c2_18 = arith.constant 2 : index
    %c0_19 = arith.constant 0 : index
    %c0_20 = arith.constant 0 : index
    %28 = vector.load %arg3[%c2_18, %c0_19, %c0_20] : memref<4x8x1xf32, #tpu.memory_space<vmem>>, vector<1x8x1xf32>
    %29 = vector.shape_cast %28 : vector<1x8x1xf32> to vector<8x1xf32>
    %30 = vector.broadcast %29 : vector<8x1xf32> to vector<8x128xf32>
    %31 = arith.addf %27, %30 : vector<8x128xf32>
    %32 = arith.negf %31 : vector<8x128xf32>
    %33 = math.exp %32 : vector<8x128xf32>
    %cst_21 = arith.constant 1.000000e+00 : f32
    %34 = vector.broadcast %cst_21 : f32 to vector<8x128xf32>
    %35 = arith.addf %34, %33 : vector<8x128xf32>
    %36 = arith.divf %34, %35 : vector<8x128xf32>
    %c3 = arith.constant 3 : index
    %c0_22 = arith.constant 0 : index
    %c0_23 = arith.constant 0 : index
    %37 = vector.load %arg2[%c3, %c0_22, %c0_23] : memref<4x8x8xf32, #tpu.memory_space<vmem>>, vector<1x8x8xf32>
    %38 = vector.shape_cast %37 : vector<1x8x8xf32> to vector<8x8xf32>
    %cst_24 = arith.constant dense<0.000000e+00> : vector<8x128xf32>
    %39 = tpu.matmul %38, %36, %cst_24 {dimension_numbers = #tpu.dot_dimension_numbers<[1], [0], [0], [1], [0, 0, 1, 1], [], []>} : vector<8x8xf32>, vector<8x128xf32>, vector<8x128xf32> -> vector<8x128xf32>
    %c3_25 = arith.constant 3 : index
    %c0_26 = arith.constant 0 : index
    %c0_27 = arith.constant 0 : index
    %40 = vector.load %arg3[%c3_25, %c0_26, %c0_27] : memref<4x8x1xf32, #tpu.memory_space<vmem>>, vector<1x8x1xf32>
    %41 = vector.shape_cast %40 : vector<1x8x1xf32> to vector<8x1xf32>
    %42 = vector.broadcast %41 : vector<8x1xf32> to vector<8x128xf32>
    %43 = arith.addf %39, %42 : vector<8x128xf32>
    %44 = arith.negf %43 : vector<8x128xf32>
    %45 = math.exp %44 : vector<8x128xf32>
    %cst_28 = arith.constant 1.000000e+00 : f32
    %46 = vector.broadcast %cst_28 : f32 to vector<8x128xf32>
    %47 = arith.addf %46, %45 : vector<8x128xf32>
    %48 = arith.divf %46, %47 : vector<8x128xf32>
    %49 = vector.extract_strided_slice %48 {offsets = [0, 0], sizes = [1, 128], strides = [1, 1]} : vector<8x128xf32> to vector<1x128xf32>
    %c0_29 = arith.constant 0 : index
    %c0_30 = arith.constant 0 : index
    %50 = vector.load %arg4[%c0_29, %c0_30] : memref<1x128xf32, #tpu.memory_space<vmem>>, vector<1x128xf32>
    tpu.vector_store %arg4[%c0_29, %c0_30], %49 {strides = array<i32>} : memref<1x128xf32, #tpu.memory_space<vmem>>, vector<1x128xf32>,
    return
  }
  func.func @transform_0(%arg0: i32) -> (i32, i32) {
    %c0_i32 = arith.constant 0 : i32
    %c0_i32_0 = arith.constant 0 : i32
    return %c0_i32, %arg0 : i32, i32
  }
  func.func @transform_1(%arg0: i32) -> (i32, i32, i32) {
    %c0_i32 = arith.constant 0 : i32
    %c0_i32_0 = arith.constant 0 : i32
    %c0_i32_1 = arith.constant 0 : i32
    %c0_i32_2 = arith.constant 0 : i32
    return %c0_i32, %c0_i32_0, %c0_i32_1 : i32, i32, i32
  }
  func.func @transform_2(%arg0: i32) -> (i32, i32, i32) {
    %c0_i32 = arith.constant 0 : i32
    %c0_i32_0 = arith.constant 0 : i32
    %c0_i32_1 = arith.constant 0 : i32
    %c0_i32_2 = arith.constant 0 : i32
    return %c0_i32, %c0_i32_0, %c0_i32_1 : i32, i32, i32
  }
  func.func @transform_3(%arg0: i32) -> (i32, i32) {
    %c0_i32 = arith.constant 0 : i32
    %c0_i32_0 = arith.constant 0 : i32
    return %c0_i32, %arg0 : i32, i32
  }
}

</mosaic_0001>

<bundles_post_ra>
// kernel: tpu_custom_call.1
= control target key start
LH: loop header
LB: loop body
LE: loop exit
PB: predicated region body
PF: predicated region fallthrough
CT: control target
= control target key end

     0   :  { %8 = vsyncpa [#allocation3], 0  ;;  %s589_s0 = inlined_call_operand.hbm [shape: f32[8,128], index: 0, kind: input, shape index: {}]   ;;  %s590_s1 = inlined_call_operand.vmem [shape: f32[4,8,8], index: 1, kind: input, shape index: {}]   ;;  %s591_s2 = inlined_call_operand.vmem [shape: f32[4,8,1], index: 2, kind: input, shape index: {}]   ;;  %s592_s3 = inlined_call_operand.hbm [shape: f32[1,128], index: 3, kind: output, shape index: {}]  }
   0x1   :  { %9 = vsyncpa [#allocation4], 0  ;;  %s508_s12 = smov [#allocation2]   ;;  %s460_s16 = scalar_lea.hbm %s589_s0, 128 }
   0x2   :  { %s16_s13 = sshll.u32 %s508_s12, 4  ;;  %p461_p0 = scmp.ne.s32.totalorder %s589_s0, %s460_s16  ;;  %s17_s13 = int_to_ptr.vmem [resolvable:$true] %s16_s13 }
   0x3   :  { %p464_p1 = scmp.lt.u32.totalorder %s460_s16, %s589_s0 }
   0x5   :  { %p466_p2 = pnand %p464_p1, %p461_p0 }
   0x7   :  { %469 = shalt.err (!%p466_p2)
}
   0x8   :  { %s470_s21 = scalar_lea.vmem %s17_s13, 128  ;;  %p475_p4 = scmp.lt.s32.totalorder %s17_s13, %s17_s13 }
   0x9   :  { %p471_p3 = scmp.ne.s32.totalorder %s17_s13, %s470_s21  ;;  %p476_p5 = scmp.lt.s32.totalorder %s470_s21, %s470_s21 }
   0xb   :  { %p477_p6 = por %p476_p5, %p475_p4 }
   0xd   :  { %p478_p7 = pnand %p477_p6, %p471_p3 }
   0xf   :  { %481 = shalt.err (!%p478_p7)
}
  0x10   :  { %19 = dma.hbm_to_vmem [thread:$0]  %s589_s0, 128, %s17_s13, [#allocation3]  }
  0x11   :  { %504 = dma.done.wait [#allocation3], 128  }
  0x12   :  { %505 = vsyncadd [#allocation3], 4294967168  ;;  %v509_v0 = vmov 0.0   ;;  %vm510_vm0 = vmmov 0   ;;  %v511_v1 = vmov 0   ;;  %vm35_vm1 = vcmask 64512  }
  0x13   :  { %417 = vmatprep.subr.mxu0 %v509_v0  ;;  %419 = vmatprep.mubr.msk.f32.mxu0 %vm510_vm0, %v509_v0  ;;  %v27_v2 = vld [vmem:[#allocation2] sm:$0xff]  ;;  %v398_v5 = vld [vmem:[%s591_s2 + $0x8] sm:$0xff]  ;;  %v402_v15 = vld [vmem:[%s591_s2 + $0x10] sm:$0xff]  ;;  %s512_s11 = smov [#allocation5]  }
  0x14   :  { %442 = vset.pattern.permute.xlu0 %v511_v1  ;;  %422 = vmatprep.subr.mxu1 %v509_v0  ;;  %v28_v3 = vld [vmem:[%s590_s1] sm:$0xff]  ;;  %v397_v13 = vld [vmem:[%s590_s1 + $0x8] sm:$0xff]  ;;  %v406_v16 = vld [vmem:[%s591_s2 + $0x18] sm:$0xff]  ;;  %s386_s12 = sshll.u32 %s512_s11, 4  ;;  %s387_s12 = int_to_ptr.vmem [resolvable:$true] %s386_s12 }
  0x15   :  { %424 = vmatprep.mubr.msk.f32.mxu1 %vm510_vm0, %v509_v0  ;;  %443 = vset.pattern.permute.xlu1 %v511_v1  ;;  %v29_v4 = vld [vmem:[%s591_s2] sm:$0xff]  ;;  %v401_v24 = vld [vmem:[%s590_s1 + $0x10] sm:$0xff]  ;;  %v405_v33 = vld [vmem:[%s590_s1 + $0x18] sm:$0xff]  ;;  %s482_s13 = scalar_lea.vmem %s387_s12, 16  ;;  %s486_s1 = scalar_lea.vmem %s387_s12, 32 }
  0x16   :  { %418 = vmatpush3.msra.mxu0 %v27_v2  ;;  %32 = vperm.xlu0 %442, %v29_v4   ;;  %p483_p8 = scmp.ne.s32.totalorder %s387_s12, %s482_s13  ;;  %p487_p9 = scmp.lt.s32.totalorder %s387_s12, %s387_s12 }
  0x17   :  { %420 = vmatmul.mubr.msk.f32.vlgmr.msra.gmra.mrb[0].mxu0 %vm35_vm1, %v28_v3  ;;  %427 = vmatprep.subr.mxu0 %v509_v0  ;;  %p488_p10 = scmp.lt.s32.totalorder %s486_s1, %s482_s13 }
  0x18   :  { %429 = vmatprep.mubr.msk.f32.mxu0 %vm510_vm0, %v509_v0  ;;  %209 = vperm.xlu1 %443, %v402_v15  }
  0x19   :  { %p489_p11 = por %p488_p10, %p487_p9 }
  0x1a   :  { %121 = vperm.xlu0 %442, %v398_v5  }
  0x1b   :  { %p490_p12 = pnand %p489_p11, %p483_p8 }
  0x1c   :  { %297 = vperm.xlu1 %443, %v406_v16  }
  0x95   :  { %v33_v6 = vpop.permute.xlu0 %32 }
  0x97   :  { %v210_v26 = vpop.permute.xlu1 %209 }
  0x99   :  { %v122_v17 = vpop.permute.xlu0 %121 }
  0x9b   :  { %v298_v35 = vpop.permute.xlu1 %297 }
  0xea   :  { %v105_v7 = vpop.f32.mrb[0].mxu0 }
  0xeb   :  { %v106_v8 = vadd.f32 %v105_v7, %v33_v6  ;;  %v421_v9 = vpop.f32.mrb[1].mxu0 }
  0xed   :  { %v396_v10 = vmul.f32 -1.442695, %v106_v8 }
  0xef   :  { %444 = vpow2.f32 %v396_v10 }
  0xf9   :  { %v445_v11 = vpop.eup %444 }
  0xfa   :  { %v112_v12 = vadd.f32 1.0, %v445_v11 }
  0xfc   :  { %446 = vrcp.f32 %v112_v12 }
 0x106   :  { %v447_v14 = vpop.eup %446 }
 0x107   :  { %423 = vmatpush3.msra.mxu1 %v447_v14 }
 0x108   :  { %425 = vmatmul.mubr.msk.f32.vlgmr.msra.gmra.mrb[0].mxu1 %vm35_vm1, %v397_v13  ;;  %432 = vmatprep.subr.mxu1 %v509_v0 }
 0x109   :  { %434 = vmatprep.mubr.msk.f32.mxu1 %vm510_vm0, %v509_v0 }
 0x1db   :  { %v193_v18 = vpop.f32.mrb[0].mxu1 }
 0x1dc   :  { %v194_v19 = vadd.f32 %v193_v18, %v122_v17  ;;  %v426_v20 = vpop.f32.mrb[1].mxu1 }
 0x1de   :  { %v400_v21 = vmul.f32 -1.442695, %v194_v19 }
 0x1e0   :  { %448 = vpow2.f32 %v400_v21 }
 0x1ea   :  { %v449_v22 = vpop.eup %448 }
 0x1eb   :  { %v200_v23 = vadd.f32 1.0, %v449_v22 }
 0x1ed   :  { %450 = vrcp.f32 %v200_v23 }
 0x1f7   :  { %v451_v25 = vpop.eup %450 }
 0x1f8   :  { %428 = vmatpush3.msra.mxu0 %v451_v25 }
 0x1f9   :  { %430 = vmatmul.mubr.msk.f32.vlgmr.msra.gmra.mrb[2].mxu0 %vm35_vm1, %v401_v24 }
 0x2cc   :  { %v281_v27 = vpop.f32.mrb[2].mxu0 }
 0x2cd   :  { %v282_v28 = vadd.f32 %v281_v27, %v210_v26  ;;  %v431_v29 = vpop.f32.mrb[3].mxu0 }
 0x2cf   :  { %v404_v30 = vmul.f32 -1.442695, %v282_v28 }
 0x2d1   :  { %452 = vpow2.f32 %v404_v30 }
 0x2db   :  { %v453_v31 = vpop.eup %452 }
 0x2dc   :  { %v288_v32 = vadd.f32 1.0, %v453_v31 }
 0x2de   :  { %454 = vrcp.f32 %v288_v32 }
 0x2e8   :  { %v455_v34 = vpop.eup %454 }
 0x2e9   :  { %433 = vmatpush3.msra.mxu1 %v455_v34 }
 0x2ea   :  { %435 = vmatmul.mubr.msk.f32.vlgmr.msra.gmra.mrb[2].mxu1 %vm35_vm1, %v405_v33 }
 0x3bd   :  { %v369_v36 = vpop.f32.mrb[2].mxu1 }
 0x3be   :  { %v370_v37 = vadd.f32 %v369_v36, %v298_v35  ;;  %v436_v38 = vpop.f32.mrb[3].mxu1 }
 0x3c0   :  { %v408_v39 = vmul.f32 -1.442695, %v370_v37 }
 0x3c2   :  { %456 = vpow2.f32 %v408_v39 }
 0x3cc   :  { %v457_v40 = vpop.eup %456 }
 0x3cd   :  { %v376_v41 = vadd.f32 1.0, %v457_v40 }
 0x3cf   :  { %458 = vrcp.f32 %v376_v41 }
 0x3d9   :  { %v459_v42 = vpop.eup %458 }
 0x3da   :  { %379 = vst [vmem:[#allocation5] sm:$0x1] %v459_v42 }
 0x3db   :  { %493 = shalt.err (!%p490_p12)
}
 0x3dc   :  { %s494_s16 = scalar_lea.hbm %s592_s3, 16 }
 0x3dd   :  { %p495_p13 = scmp.ne.s32.totalorder %s592_s3, %s494_s16  ;;  %p498_p0 = scmp.lt.u32.totalorder %s494_s16, %s592_s3 }
 0x3df   :  { %p500_p1 = pnand %p498_p0, %p495_p13 }
 0x3e1   :  { %503 = shalt.err (!%p500_p1)
}
 0x3e2   :  { %389 = dma.vmem_to_hbm [thread:$0]  %s387_s12, 16, %s592_s3, [#allocation4]  }
 0x3e3   :  { %506 = dma.done.wait [#allocation4], 16  }
 0x3e4   :  { %507 = vsyncadd [#allocation4], 4294967280 }
 0x3e5   :  { %393 = vsyncpa [#allocation3], 1 }
 0x3e6   :  { %394 = vsyncpa [#allocation4], 1 }

</bundles_post_ra>
